<compile_context>
chip_gen: v7x
topology: tpu7x:2x2x1
jax: 0.10.0
libtpu: 0.0.40
codegen_flags: <defaults>
</compile_context>

<pallas_src>
import functools

import jax
import jax.numpy as jnp
from jax import lax
from jax.experimental import pallas as pl
from jax.experimental.pallas import tpu as pltpu

_NEG_BIG = -1e30  # finite vocab-padding value (avoids -inf - -inf NaNs)


def _round_up(x, m):
    return (x + m - 1) // m * m


def _cdiv(a, b):
    return (a + b - 1) // b


def _ce_acc_kernel(vocab_size,                    # python int (closed over)
                   nvalid_ref,                    # SMEM scalar prefetch: (1,) int32
                   logits_ref, tgt_ref,           # inputs: (TR, TV), (TR, 1)
                   nll_ref, acc_ref,              # outputs: (1, 1, 1) each
                   m_sc, l_sc, tl_sc):            # scratch: (TR, 1) f32 each
    p = pl.program_id(0)       # parallel (megacore) slice
    r = pl.program_id(1)       # row tile within slice
    vk = pl.program_id(2)      # vocab chunk (reduction axis, innermost)
    n_row_tiles = pl.num_programs(1)
    n_vocab_tiles = pl.num_programs(2)

    # Zero this slice's output accumulators once.
    @pl.when((r == 0) & (vk == 0))
    def _():
        nll_ref[...] = jnp.zeros_like(nll_ref)
        acc_ref[...] = jnp.zeros_like(acc_ref)

    # Reset per-row online-softmax state at the start of each vocab sweep.
    @pl.when(vk == 0)
    def _():
        m_sc[...] = jnp.full_like(m_sc, -jnp.inf)
        l_sc[...] = jnp.zeros_like(l_sc)
        tl_sc[...] = jnp.zeros_like(tl_sc)

    x = logits_ref[...].astype(jnp.float32)       # (TR, TV) -- f32 math even for bf16 in
    t = tgt_ref[...].astype(jnp.int32)            # (TR, 1)
    row_tile, v_tile = x.shape

    # Online (flash-style) log-sum-exp across vocab chunks.
    m_prev = m_sc[...]
    m_new = jnp.maximum(m_prev, jnp.max(x, axis=-1, keepdims=True))
    l_sc[...] = (l_sc[...] * jnp.exp(m_prev - m_new)
                 + jnp.sum(jnp.exp(x - m_new), axis=-1, keepdims=True))
    m_sc[...] = m_new

    # Logit at the target index (exactly one vocab chunk contains it).
    lane = lax.broadcasted_iota(jnp.int32, x.shape, 1) + vk * v_tile
    tl_sc[...] += jnp.sum(jnp.where(lane == t, x, 0.0), axis=-1, keepdims=True)

    @pl.when(vk == n_vocab_tiles - 1)
    def _():
        lse = jnp.log(l_sc[...]) + m_sc[...]                      # (TR, 1)
        tl = tl_sc[...]                                           # (TR, 1)

        # Mask padded rows and ignored / out-of-range targets.
        row0 = (p * n_row_tiles + r) * row_tile
        rows = row0 + lax.broadcasted_iota(jnp.int32, (row_tile, 1), 0)
        row_ok = rows < nvalid_ref[0]
        tgt_ok = jnp.logical_and(t >= 0, t < vocab_size)
        ce_mask = jnp.logical_and(row_ok, tgt_ok)

        nll_ref[...] += jnp.sum(jnp.where(ce_mask, lse - tl, 0.0))

        # Argmax-free correctness: target logit equals the row max.
        # (Only differs from jnp.argmax on exact float ties.)
        correct = jnp.logical_and(ce_mask, tl >= m_sc[...])
        acc_ref[...] += jnp.sum(correct.astype(jnp.float32))


def ce_and_token_accuracy(logits_2d, targets_1d, *,
                          ignore_index=-100,
                          num_parallel=2,
                          target_block_bytes=4 * 1024 * 1024,
                          max_vocab_tile=8192):
    """logits_2d: [N, V] float (f32 or bf16), targets_1d: [N] int -> (mean_nll, token_accuracy)."""
    n, v = logits_2d.shape
    itemsize = jnp.dtype(logits_2d.dtype).itemsize

    # ---- tile selection ----
    v_tile = min(_round_up(v, 128), max_vocab_tile)
    v_pad = _round_up(_round_up(v, 128), v_tile)
    n_vocab_tiles = v_pad // v_tile

    row_tile = target_block_bytes // (v_tile * itemsize)
    row_tile = int(max(16, min(row_tile, 512)))
    row_tile = (row_tile // 16) * 16                       # bf16 sublane packing
    row_tile = min(row_tile, _round_up(n, 16))             # don't dwarf the problem

    n_row_tiles_total = _cdiv(n, row_tile)
    p = int(num_parallel) if n_row_tiles_total >= int(num_parallel) else 1
    rows_per_slice = _round_up(_cdiv(n, p), row_tile)
    n_pad = rows_per_slice * p
    n_row_tiles = rows_per_slice // row_tile

    # ---- pad inputs (rows + vocab); padded logits get a big negative value ----
    logits_p = logits_2d
    if (n_pad - n) or (v_pad - v):
        logits_p = jnp.pad(logits_2d, ((0, n_pad - n), (0, v_pad - v)),
                           constant_values=_NEG_BIG)
    tgt_p = targets_1d.astype(jnp.int32)
    if n_pad - n:
        tgt_p = jnp.concatenate(
            [tgt_p, jnp.full((n_pad - n,), ignore_index, jnp.int32)])
    tgt_2d = tgt_p.reshape(n_pad, 1)

    n_valid = jnp.array([n], dtype=jnp.int32)

    block_bytes = row_tile * v_tile * itemsize
    vmem_limit = int(min(48 * 1024 * 1024, max(32 * 1024 * 1024, 3 * block_bytes)))

    kernel = functools.partial(_ce_acc_kernel, v)

    nll_out, acc_out = pl.pallas_call(
        kernel,
        out_shape=(
            jax.ShapeDtypeStruct((p, 1, 1), jnp.float32),
            jax.ShapeDtypeStruct((p, 1, 1), jnp.float32),
        ),
        grid_spec=pltpu.PrefetchScalarGridSpec(
            num_scalar_prefetch=1,
            grid=(p, n_row_tiles, n_vocab_tiles),
            in_specs=[
                pl.BlockSpec((row_tile, v_tile),
                             lambda pi, ri, vi, nv: (pi * n_row_tiles + ri, vi)),
                pl.BlockSpec((row_tile, 1),
                             lambda pi, ri, vi, nv: (pi * n_row_tiles + ri, 0)),
            ],
            out_specs=[
                pl.BlockSpec((1, 1, 1), lambda pi, ri, vi, nv: (pi, 0, 0)),
                pl.BlockSpec((1, 1, 1), lambda pi, ri, vi, nv: (pi, 0, 0)),
            ],
            scratch_shapes=[
                pltpu.VMEM((row_tile, 1), jnp.float32),   # running max
                pltpu.VMEM((row_tile, 1), jnp.float32),   # running sum-exp
                pltpu.VMEM((row_tile, 1), jnp.float32),   # running target logit
            ],
        ),
        compiler_params=pltpu.CompilerParams(
            dimension_semantics=("parallel", "arbitrary", "arbitrary"),
            vmem_limit_bytes=vmem_limit,
        ),
    )(n_valid, logits_p, tgt_2d)

    nll_sum = jnp.sum(nll_out[:, 0, 0])
    correct = jnp.sum(acc_out[:, 0, 0])

    t32 = targets_1d.astype(jnp.int32)
    n_ce = jnp.sum(((t32 != ignore_index) & (t32 >= 0) & (t32 < v))
                   .astype(jnp.float32))
    mean_nll = nll_sum / jnp.maximum(n_ce, 1.0)
    token_acc = correct / jnp.float32(n)
    return mean_nll, token_acc


def _token_reward_from_accuracy(token_accuracy):
    """Mirrors _calculate_token_reward's threshold ladder."""
    return jnp.where(
        token_accuracy > 0.9, 1.0,
        jnp.where(token_accuracy > 0.8, 0.5,
                  jnp.where(token_accuracy > 0.7, 0.2, 0.0))).astype(jnp.float32)


class AtomCountAwareLossJax:
    """JAX/Pallas re-implementation of AtomCountAwareLoss.forward semantics."""

    def __init__(self, validity_weight=0.3, hc_count_weight=0.4, token_weight=0.3,
                 ignore_index=-100):
        total = validity_weight + hc_count_weight + token_weight
        self.validity_weight = validity_weight / total
        self.hc_count_weight = hc_count_weight / total
        self.token_weight = token_weight / total
        self.ignore_index = ignore_index

    def __call__(self, outputs, targets,
                 validity_penalties=None, hc_count_penalties=None):
        """
        outputs: [B, S, V] logits (f32 or bf16), targets: [B, S] int token ids.
        validity_penalties / hc_count_penalties: optional [B] float arrays standing in
        for the RDKit-derived per-sample penalties (cannot be computed on-device).
        """
        b, s, v = outputs.shape
        logits_2d = outputs.reshape(b * s, v)
        targets_1d = targets.reshape(b * s)

        base_loss, token_acc = ce_and_token_accuracy(
            logits_2d, targets_1d, ignore_index=self.ignore_index)

        loss_components = {
            "base_loss": base_loss,
            "validity_penalty": jnp.float32(0.0),
            "hc_count_penalty": jnp.float32(0.0),
            "token_reward": jnp.float32(0.0),
        }

        if validity_penalties is not None and hc_count_penalties is not None:
            avg_validity = jnp.mean(validity_penalties.astype(jnp.float32))
            avg_hc = jnp.mean(hc_count_penalties.astype(jnp.float32))
            token_reward = _token_reward_from_accuracy(token_acc)
            total_loss = (self.token_weight * base_loss
                          + self.validity_weight * avg_validity
                          + self.hc_count_weight * avg_hc
                          - 0.1 * token_reward)
            loss_components.update({
                "validity_penalty": avg_validity,
                "hc_count_penalty": avg_hc,
                "token_reward": token_reward,
                "validity_rate": 1.0 - avg_validity / 2.0,
                "hc_match_rate": 1.0 - avg_hc,
            })
            return total_loss, loss_components

        return base_loss, loss_components


if __name__ == "__main__":
    key = jax.random.PRNGKey(0)

    # ---------- Test 1: module-level forward at small [B, S, V] shapes ----------
    B, S, V = 2, 8, 32
    k1, k2, k3, k4, k5 = jax.random.split(key, 5)
    outputs = jax.random.normal(k1, (B, S, V), dtype=jnp.float32)
    targets = jax.random.randint(k2, (B, S), 0, V, dtype=jnp.int32)
    # Stand-ins for RDKit-derived per-sample penalties (deterministic).
    validity_penalties = jax.random.choice(k3, jnp.array([0.0, 1.0, 2.0]), (B,))
    hc_count_penalties = jax.random.uniform(k4, (B,), minval=0.0, maxval=1.0)

    loss_mod = AtomCountAwareLossJax()

    base_loss, comps = loss_mod(outputs, targets)
    jax.block_until_ready(base_loss)

    total_loss, comps_full = loss_mod(outputs, targets,
                                      validity_penalties, hc_count_penalties)
    jax.block_until_ready(total_loss)

    logits_2d = outputs.reshape(-1, V)
    tgt_1d = targets.reshape(-1)
    ref_lsm = jax.nn.log_softmax(logits_2d, axis=-1)
    ref_base = -jnp.mean(ref_lsm[jnp.arange(B * S), tgt_1d])
    ref_acc = jnp.mean((jnp.argmax(logits_2d, -1) == tgt_1d).astype(jnp.float32))
    _, kernel_acc = ce_and_token_accuracy(logits_2d, tgt_1d)
    assert jnp.allclose(base_loss, ref_base, atol=1e-5), (base_loss, ref_base)
    assert jnp.allclose(kernel_acc, ref_acc, atol=1e-6), (kernel_acc, ref_acc)

    # ---------- Test 2: bf16 logits, ragged N, vocab chunking, 2-way parallel,
    #            ignore_index handling ----------
    N2, V2 = 148, 160
    kx, kt, ki = jax.random.split(k5, 3)
    logits_b = jax.random.normal(kx, (N2, V2), dtype=jnp.float32).astype(jnp.bfloat16)
    tgt_b = jax.random.randint(kt, (N2,), 0, V2, dtype=jnp.int32)
    ignore_mask = jax.random.uniform(ki, (N2,)) < 0.2
    tgt_b = jnp.where(ignore_mask, -100, tgt_b)

    nll2, acc2 = ce_and_token_accuracy(
        logits_b, tgt_b, max_vocab_tile=128, target_block_bytes=32 * 1024)
    jax.block_until_ready(nll2)

    lf = logits_b.astype(jnp.float32)
    lsm2 = jax.nn.log_softmax(lf, axis=-1)
    valid2 = tgt_b != -100
    tsafe = jnp.where(valid2, tgt_b, 0)
    n_valid2 = jnp.maximum(jnp.sum(valid2.astype(jnp.float32)), 1.0)
    nll_ref2 = jnp.sum(jnp.where(valid2, -lsm2[jnp.arange(N2), tsafe], 0.0)) / n_valid2
    # tie-consistent accuracy reference (kernel counts target-logit == row max)
    row_max = jnp.max(lf, axis=-1)
    acc_ref2 = jnp.mean(
        jnp.where(valid2, lf[jnp.arange(N2), tsafe] >= row_max, False)
        .astype(jnp.float32))
    assert jnp.allclose(nll2, nll_ref2, atol=2e-3, rtol=2e-3), (nll2, nll_ref2)
    assert jnp.allclose(acc2, acc_ref2, atol=1e-6), (acc2, acc_ref2)

    print("KERNEL_OK")
</pallas_src>

<mosaic_0001>
module attributes {stable_mosaic.version = 11 : i64} {
  func.func @_ce_acc_kernel(%arg0: i32, %arg1: i32, %arg2: i32, %arg3: memref<1xi32, #tpu.memory_space<smem>>, %arg4: memref<16x128xf32, #tpu.memory_space<vmem>>, %arg5: memref<16x1xi32, #tpu.memory_space<vmem>>, %arg6: memref<1x1x1xf32, #tpu.memory_space<vmem>>, %arg7: memref<1x1x1xf32, #tpu.memory_space<vmem>>, %arg8: memref<16x1xf32, #tpu.memory_space<vmem>>, %arg9: memref<16x1xf32, #tpu.memory_space<vmem>>, %arg10: memref<16x1xf32, #tpu.memory_space<vmem>>) attributes {dimension_semantics = [#tpu.dimension_semantics<parallel>, #tpu.dimension_semantics<arbitrary>, #tpu.dimension_semantics<arbitrary>], iteration_bounds = array<i64: 1, 1, 1>, scalar_prefetch = 1 : i64, scratch_operands = 3 : i64, tpu.core_type = #tpu.core_type<tc>, window_params = [{transform_indices = @transform_0, window_bounds = array<i64: 16, 128>}, {transform_indices = @transform_1, window_bounds = array<i64: 16, 1>}, {transform_indices = @transform_2, window_bounds = array<i64: 1, 1, 1>}, {transform_indices = @transform_3, window_bounds = array<i64: 1, 1, 1>}]} {
    %c0_i32 = arith.constant 0 : i32
    %0 = arith.cmpi eq, %arg1, %c0_i32 : i32
    %c0_i32_0 = arith.constant 0 : i32
    %1 = arith.cmpi eq, %arg2, %c0_i32_0 : i32
    %2 = arith.andi %0, %1 : i1
    %3 = arith.extui %2 : i1 to i32
    %c0_i32_1 = arith.constant 0 : i32
    %4 = arith.cmpi ne, %3, %c0_i32_1 : i32
    scf.if %4 {
      %cst_24 = arith.constant 0.000000e+00 : f32
      %42 = vector.broadcast %cst_24 : f32 to vector<1x1x1xf32>
      %c0_25 = arith.constant 0 : index
      %c0_26 = arith.constant 0 : index
      %c0_27 = arith.constant 0 : index
      %43 = vector.load %arg6[%c0_25, %c0_26, %c0_27] : memref<1x1x1xf32, #tpu.memory_space<vmem>>, vector<1x1x1xf32>
      tpu.vector_store %arg6[%c0_25, %c0_26, %c0_27], %42 {strides = array<i32>} : memref<1x1x1xf32, #tpu.memory_space<vmem>>, vector<1x1x1xf32>,
      %cst_28 = arith.constant 0.000000e+00 : f32
      %44 = vector.broadcast %cst_28 : f32 to vector<1x1x1xf32>
      %c0_29 = arith.constant 0 : index
      %c0_30 = arith.constant 0 : index
      %c0_31 = arith.constant 0 : index
      %45 = vector.load %arg7[%c0_29, %c0_30, %c0_31] : memref<1x1x1xf32, #tpu.memory_space<vmem>>, vector<1x1x1xf32>
      tpu.vector_store %arg7[%c0_29, %c0_30, %c0_31], %44 {strides = array<i32>} : memref<1x1x1xf32, #tpu.memory_space<vmem>>, vector<1x1x1xf32>,
    } else {
    }
    %c0_i32_2 = arith.constant 0 : i32
    %5 = arith.cmpi eq, %arg2, %c0_i32_2 : i32
    %6 = arith.extui %5 : i1 to i32
    %c0_i32_3 = arith.constant 0 : i32
    %7 = arith.cmpi ne, %6, %c0_i32_3 : i32
    scf.if %7 {
      %cst_24 = arith.constant 0xFF800000 : f32
      %42 = vector.broadcast %cst_24 : f32 to vector<16x1xf32>
      %c0_25 = arith.constant 0 : index
      %c0_26 = arith.constant 0 : index
      %43 = vector.load %arg8[%c0_25, %c0_26] : memref<16x1xf32, #tpu.memory_space<vmem>>, vector<16x1xf32>
      tpu.vector_store %arg8[%c0_25, %c0_26], %42 {strides = array<i32>} : memref<16x1xf32, #tpu.memory_space<vmem>>, vector<16x1xf32>,
      %cst_27 = arith.constant 0.000000e+00 : f32
      %44 = vector.broadcast %cst_27 : f32 to vector<16x1xf32>
      %c0_28 = arith.constant 0 : index
      %c0_29 = arith.constant 0 : index
      %45 = vector.load %arg9[%c0_28, %c0_29] : memref<16x1xf32, #tpu.memory_space<vmem>>, vector<16x1xf32>
      tpu.vector_store %arg9[%c0_28, %c0_29], %44 {strides = array<i32>} : memref<16x1xf32, #tpu.memory_space<vmem>>, vector<16x1xf32>,
      %cst_30 = arith.constant 0.000000e+00 : f32
      %46 = vector.broadcast %cst_30 : f32 to vector<16x1xf32>
      %c0_31 = arith.constant 0 : index
      %c0_32 = arith.constant 0 : index
      %47 = vector.load %arg10[%c0_31, %c0_32] : memref<16x1xf32, #tpu.memory_space<vmem>>, vector<16x1xf32>
      tpu.vector_store %arg10[%c0_31, %c0_32], %46 {strides = array<i32>} : memref<16x1xf32, #tpu.memory_space<vmem>>, vector<16x1xf32>,
    } else {
    }
    %c0 = arith.constant 0 : index
    %c0_4 = arith.constant 0 : index
    %8 = vector.load %arg4[%c0, %c0_4] : memref<16x128xf32, #tpu.memory_space<vmem>>, vector<16x128xf32>
    %c0_5 = arith.constant 0 : index
    %c0_6 = arith.constant 0 : index
    %9 = vector.load %arg5[%c0_5, %c0_6] : memref<16x1xi32, #tpu.memory_space<vmem>>, vector<16x1xi32>
    %c0_7 = arith.constant 0 : index
    %c0_8 = arith.constant 0 : index
    %10 = vector.load %arg8[%c0_7, %c0_8] : memref<16x1xf32, #tpu.memory_space<vmem>>, vector<16x1xf32>
    %cst = arith.constant dense<0xFF800000> : vector<16xf32>
    %11 = vector.multi_reduction <maximumf>, %8, %cst [1] : vector<16x128xf32> to vector<16xf32>
    %12 = vector.shape_cast %11 : vector<16xf32> to vector<16x1xf32>
    %13 = arith.maximumf %10, %12 : vector<16x1xf32>
    %c0_9 = arith.constant 0 : index
    %c0_10 = arith.constant 0 : index
    %14 = vector.load %arg9[%c0_9, %c0_10] : memref<16x1xf32, #tpu.memory_space<vmem>>, vector<16x1xf32>
    %15 = arith.subf %10, %13 : vector<16x1xf32>
    %16 = math.exp %15 : vector<16x1xf32>
    %17 = arith.mulf %14, %16 : vector<16x1xf32>
    %18 = vector.broadcast %13 : vector<16x1xf32> to vector<16x128xf32>
    %19 = arith.subf %8, %18 : vector<16x128xf32>
    %20 = math.exp %19 : vector<16x128xf32>
    %cst_11 = arith.constant dense<0.000000e+00> : vector<16xf32>
    %21 = vector.multi_reduction <add>, %20, %cst_11 [1] : vector<16x128xf32> to vector<16xf32>
    %22 = vector.shape_cast %21 : vector<16xf32> to vector<16x1xf32>
    %23 = arith.addf %17, %22 : vector<16x1xf32>
    %c0_12 = arith.constant 0 : index
    %c0_13 = arith.constant 0 : index
    %24 = vector.load %arg9[%c0_12, %c0_13] : memref<16x1xf32, #tpu.memory_space<vmem>>, vector<16x1xf32>
    tpu.vector_store %arg9[%c0_12, %c0_13], %23 {strides = array<i32>} : memref<16x1xf32, #tpu.memory_space<vmem>>, vector<16x1xf32>,
    %c0_14 = arith.constant 0 : index
    %c0_15 = arith.constant 0 : index
    %25 = vector.load %arg8[%c0_14, %c0_15] : memref<16x1xf32, #tpu.memory_space<vmem>>, vector<16x1xf32>
    tpu.vector_store %arg8[%c0_14, %c0_15], %13 {strides = array<i32>} : memref<16x1xf32, #tpu.memory_space<vmem>>, vector<16x1xf32>,
    %26 = tpu.iota {dimensions = array<i32: 1>} : vector<16x128xi32>
    %c128_i32 = arith.constant 128 : i32
    %27 = arith.muli %arg2, %c128_i32 : i32
    %28 = vector.broadcast %27 : i32 to vector<16x128xi32>
    %29 = arith.addi %26, %28 : vector<16x128xi32>
    %c0_16 = arith.constant 0 : index
    %c0_17 = arith.constant 0 : index
    %30 = vector.load %arg10[%c0_16, %c0_17] : memref<16x1xf32, #tpu.memory_space<vmem>>, vector<16x1xf32>
    %31 = vector.broadcast %9 : vector<16x1xi32> to vector<16x128xi32>
    %32 = arith.cmpi eq, %29, %31 : vector<16x128xi32>
    %cst_18 = arith.constant 0.000000e+00 : f32
    %33 = vector.broadcast %cst_18 : f32 to vector<16x128xf32>
    %34 = arith.select %32, %8, %33 : vector<16x128xi1>, vector<16x128xf32>
    %cst_19 = arith.constant dense<0.000000e+00> : vector<16xf32>
    %35 = vector.multi_reduction <add>, %34, %cst_19 [1] : vector<16x128xf32> to vector<16xf32>
    %36 = vector.shape_cast %35 : vector<16xf32> to vector<16x1xf32>
    %37 = arith.addf %30, %36 : vector<16x1xf32>
    %c0_20 = arith.constant 0 : index
    %c0_21 = arith.constant 0 : index
    %38 = vector.load %arg10[%c0_20, %c0_21] : memref<16x1xf32, #tpu.memory_space<vmem>>, vector<16x1xf32>
    tpu.vector_store %arg10[%c0_20, %c0_21], %37 {strides = array<i32>} : memref<16x1xf32, #tpu.memory_space<vmem>>, vector<16x1xf32>,
    %c0_i32_22 = arith.constant 0 : i32
    %39 = arith.cmpi eq, %arg2, %c0_i32_22 : i32
    %40 = arith.extui %39 : i1 to i32
    %c0_i32_23 = arith.constant 0 : i32
    %41 = arith.cmpi ne, %40, %c0_i32_23 : i32
    scf.if %41 {
      %c0_24 = arith.constant 0 : index
      %c0_25 = arith.constant 0 : index
      %42 = vector.load %arg9[%c0_24, %c0_25] : memref<16x1xf32, #tpu.memory_space<vmem>>, vector<16x1xf32>
      %43 = math.log %42 : vector<16x1xf32>
      %c0_26 = arith.constant 0 : index
      %c0_27 = arith.constant 0 : index
      %44 = vector.load %arg8[%c0_26, %c0_27] : memref<16x1xf32, #tpu.memory_space<vmem>>, vector<16x1xf32>
      %45 = arith.addf %43, %44 : vector<16x1xf32>
      %c0_28 = arith.constant 0 : index
      %c0_29 = arith.constant 0 : index
      %46 = vector.load %arg10[%c0_28, %c0_29] : memref<16x1xf32, #tpu.memory_space<vmem>>, vector<16x1xf32>
      %c1_i32 = arith.constant 1 : i32
      %47 = arith.muli %arg0, %c1_i32 : i32
      %48 = arith.addi %47, %arg1 : i32
      %c16_i32 = arith.constant 16 : i32
      %49 = arith.muli %48, %c16_i32 : i32
      %50 = tpu.iota {dimensions = array<i32: 0>} : vector<16x1xi32>
      %51 = vector.broadcast %49 : i32 to vector<16x1xi32>
      %52 = arith.addi %51, %50 : vector<16x1xi32>
      %c0_30 = arith.constant 0 : index
      %53 = memref.load %arg3[%c0_30] : memref<1xi32, #tpu.memory_space<smem>>
      %54 = vector.broadcast %53 : i32 to vector<16x1xi32>
      %55 = arith.cmpi slt, %52, %54 : vector<16x1xi32>
      %c0_i32_31 = arith.constant 0 : i32
      %56 = vector.broadcast %c0_i32_31 : i32 to vector<16x1xi32>
      %57 = arith.cmpi sge, %9, %56 : vector<16x1xi32>
      %c32_i32 = arith.constant 32 : i32
      %58 = vector.broadcast %c32_i32 : i32 to vector<16x1xi32>
      %59 = arith.cmpi slt, %9, %58 : vector<16x1xi32>
      %60 = arith.andi %57, %59 : vector<16x1xi1>
      %61 = arith.andi %55, %60 : vector<16x1xi1>
      %c0_32 = arith.constant 0 : index
      %c0_33 = arith.constant 0 : index
      %c0_34 = arith.constant 0 : index
      %62 = vector.load %arg6[%c0_32, %c0_33, %c0_34] : memref<1x1x1xf32, #tpu.memory_space<vmem>>, vector<1x1x1xf32>
      %63 = arith.subf %45, %46 : vector<16x1xf32>
      %cst_35 = arith.constant 0.000000e+00 : f32
      %64 = vector.broadcast %cst_35 : f32 to vector<16x1xf32>
      %65 = arith.select %61, %63, %64 : vector<16x1xi1>, vector<16x1xf32>
      %66 = vector.shape_cast %65 : vector<16x1xf32> to vector<1x16x1xf32>
      %cst_36 = arith.constant dense<0.000000e+00> : vector<1xf32>
      %67 = vector.multi_reduction <add>, %66, %cst_36 [1, 2] : vector<1x16x1xf32> to vector<1xf32>
      %68 = vector.shape_cast %67 : vector<1xf32> to vector<1x1x1xf32>
      %69 = vector.extract %68[0, 0, 0] : f32 from vector<1x1x1xf32>
      %70 = vector.broadcast %69 : f32 to vector<1x1x1xf32>
      %71 = arith.addf %62, %70 : vector<1x1x1xf32>
      %c0_37 = arith.constant 0 : index
      %c0_38 = arith.constant 0 : index
      %c0_39 = arith.constant 0 : index
      %72 = vector.load %arg6[%c0_37, %c0_38, %c0_39] : memref<1x1x1xf32, #tpu.memory_space<vmem>>, vector<1x1x1xf32>
      tpu.vector_store %arg6[%c0_37, %c0_38, %c0_39], %71 {strides = array<i32>} : memref<1x1x1xf32, #tpu.memory_space<vmem>>, vector<1x1x1xf32>,
      %c0_40 = arith.constant 0 : index
      %c0_41 = arith.constant 0 : index
      %73 = vector.load %arg8[%c0_40, %c0_41] : memref<16x1xf32, #tpu.memory_space<vmem>>, vector<16x1xf32>
      %74 = arith.cmpf oge, %46, %73 : vector<16x1xf32>
      %75 = arith.andi %61, %74 : vector<16x1xi1>
      %c0_42 = arith.constant 0 : index
      %c0_43 = arith.constant 0 : index
      %c0_44 = arith.constant 0 : index
      %76 = vector.load %arg7[%c0_42, %c0_43, %c0_44] : memref<1x1x1xf32, #tpu.memory_space<vmem>>, vector<1x1x1xf32>
      %77 = arith.extui %75 : vector<16x1xi1> to vector<16x1xi32>
      %78 = arith.sitofp %77 : vector<16x1xi32> to vector<16x1xf32>
      %79 = vector.shape_cast %78 : vector<16x1xf32> to vector<1x16x1xf32>
      %cst_45 = arith.constant dense<0.000000e+00> : vector<1xf32>
      %80 = vector.multi_reduction <add>, %79, %cst_45 [1, 2] : vector<1x16x1xf32> to vector<1xf32>
      %81 = vector.shape_cast %80 : vector<1xf32> to vector<1x1x1xf32>
      %82 = vector.extract %81[0, 0, 0] : f32 from vector<1x1x1xf32>
      %83 = vector.broadcast %82 : f32 to vector<1x1x1xf32>
      %84 = arith.addf %76, %83 : vector<1x1x1xf32>
      %c0_46 = arith.constant 0 : index
      %c0_47 = arith.constant 0 : index
      %c0_48 = arith.constant 0 : index
      %85 = vector.load %arg7[%c0_46, %c0_47, %c0_48] : memref<1x1x1xf32, #tpu.memory_space<vmem>>, vector<1x1x1xf32>
      tpu.vector_store %arg7[%c0_46, %c0_47, %c0_48], %84 {strides = array<i32>} : memref<1x1x1xf32, #tpu.memory_space<vmem>>, vector<1x1x1xf32>,
    } else {
    }
    return
  }
  func.func @transform_0(%arg0: i32, %arg1: i32, %arg2: i32, %arg3: memref<1xi32, #tpu.memory_space<smem>>) -> (i32, i32) {
    %c1_i32 = arith.constant 1 : i32
    %0 = arith.muli %arg0, %c1_i32 : i32
    %1 = arith.addi %0, %arg1 : i32
    %c0_i32 = arith.constant 0 : i32
    return %1, %arg2 : i32, i32
  }
  func.func @transform_1(%arg0: i32, %arg1: i32, %arg2: i32, %arg3: memref<1xi32, #tpu.memory_space<smem>>) -> (i32, i32) {
    %c1_i32 = arith.constant 1 : i32
    %0 = arith.muli %arg0, %c1_i32 : i32
    %1 = arith.addi %0, %arg1 : i32
    %c0_i32 = arith.constant 0 : i32
    %c0_i32_0 = arith.constant 0 : i32
    return %1, %c0_i32 : i32, i32
  }
  func.func @transform_2(%arg0: i32, %arg1: i32, %arg2: i32, %arg3: memref<1xi32, #tpu.memory_space<smem>>) -> (i32, i32, i32) {
    %c0_i32 = arith.constant 0 : i32
    %c0_i32_0 = arith.constant 0 : i32
    %c0_i32_1 = arith.constant 0 : i32
    return %arg0, %c0_i32, %c0_i32_0 : i32, i32, i32
  }
  func.func @transform_3(%arg0: i32, %arg1: i32, %arg2: i32, %arg3: memref<1xi32, #tpu.memory_space<smem>>) -> (i32, i32, i32) {
    %c0_i32 = arith.constant 0 : i32
    %c0_i32_0 = arith.constant 0 : i32
    %c0_i32_1 = arith.constant 0 : i32
    return %arg0, %c0_i32, %c0_i32_0 : i32, i32, i32
  }
}

</mosaic_0001>

<bundles_post_ra>
// kernel: tpu_custom_call.1
= control target key start
LH: loop header
LB: loop body
LE: loop exit
PB: predicated region body
PF: predicated region fallthrough
CT: control target
= control target key end

     0   :  { %11 = vsyncpa [#allocation8], 0  ;;  %v349_v1 = vmov 0   ;;  %s490_s0 = inlined_call_operand.<no memory space> [shape: s32[1], index: 0, kind: input, shape index: {}]   ;;  %s491_s1 = inlined_call_operand.vmem [shape: f32[16,128], index: 1, kind: input, shape index: {}]   ;;  %s492_s2 = inlined_call_operand.vmem [shape: s32[16,1], index: 2, kind: input, shape index: {}]   ;;  %s493_s3 = inlined_call_operand.hbm [shape: f32[1,1,1], index: 3, kind: output, shape index: {0}]   ;;  %s494_s4 = inlined_call_operand.hbm [shape: f32[1,1,1], index: 4, kind: output, shape index: {1}]  }
   0x1   :  { %v80_v0 = vld [vmem:[%s491_s1] sm:$0xff]  ;;  %287 = vset.pattern.permute.xlu1 %v349_v1 }
   0x2   :  { %86 = vmax.xlane.f32.xlu0 %v80_v0 }
   0x3   :  { %12 = vsyncpa [#allocation10], 0  ;;  %v81_v2 = vld [vmem:[%s491_s1 + $0x8] sm:$0xff]  ;;  %288 = vset.pattern.permute.xlu0 %v349_v1  ;;  %vm73_vm0 = vcmask 7168   ;;  %v350_v3 = vmov -inf   ;;  %v82_v4 = vld [vmem:[%s492_s2] sm:$0xff]  ;;  %v129_v13 = vlaneseq  ;;  %v178_v21 = vstv %s490_s0 }
   0x4   :  { %74 = vst.msk [vmem:[#allocation2] sm:$0xff] %vm73_vm0, %v350_v3  ;;  %75 = vst.msk [vmem:[#allocation2 + $0x8] sm:$0xff] %vm73_vm0, %v350_v3  ;;  %v351_v5 = vmov 0.0   ;;  %v83_v15 = vld [vmem:[%s492_s2 + $0x8] sm:$0xff]  ;;  %vm181_vm2 = vcmp.ge.s32.totalorder %v82_v4, 0  ;;  %vm183_vm3 = vcmp.lt.s32.totalorder %v82_v4, 32 }
   0x5   :  { %78 = vst.msk [vmem:[#allocation4] sm:$0xff] %vm73_vm0, %v351_v5  ;;  %76 = vst.msk [vmem:[#allocation3] sm:$0xff] %vm73_vm0, %v351_v5  ;;  %v130_v16 = vand.u32 127, %v129_v13  ;;  %v172_v19 = vshrl.u32 %v129_v13, 7  ;;  %vm182_vm8 = vcmp.ge.s32.totalorder %v83_v15, 0  ;;  %vm184_vm9 = vcmp.lt.s32.totalorder %v83_v15, 32 }
   0x6   :  { %88 = vmax.xlane.f32.xlu0 %v81_v2  ;;  %77 = vst.msk [vmem:[#allocation3 + $0x8] sm:$0xff] %vm73_vm0, %v351_v5  ;;  %79 = vst.msk [vmem:[#allocation4 + $0x8] sm:$0xff] %vm73_vm0, %v351_v5  ;;  %s352_s0 = smov [#allocation7]   ;;  %s353_s25 = smov [#allocation9]  }
   0x7   :  { %vm403_vm4 = vmand %vm181_vm2, %vm183_vm3  ;;  %vm410_vm5 = vcmp.lt.s32.totalorder %v172_v19, %v178_v21  ;;  %v173_v53 = vadd.s32 8, %v172_v19  ;;  %vm67_vm2 = vcmask 0   ;;  %s242_s2 = sshll.u32 %s352_s0, 4  ;;  %s252_s26 = sshll.u32 %s353_s25, 4  ;;  %s243_s2 = int_to_ptr.vmem [resolvable:$true] %s242_s2  ;;  %s253_s26 = int_to_ptr.vmem [resolvable:$true] %s252_s26 }
   0x8   :  { %vm187_vm6 = vmand %vm410_vm5, %vm403_vm4  ;;  %68 = vst.msk [vmem:[#allocation7] sm:$0x1] %vm67_vm2, %v351_v5  ;;  %s301_s28 = scalar_lea.vmem %s243_s2, 16  ;;  %s305_s29 = scalar_lea.vmem %s243_s2, 32 }
   0x9   :  { %vm422_vm11 = vmand %vm182_vm8, %vm184_vm9  ;;  %vm426_vm12 = vcmp.lt.s32.totalorder %v173_v53, %v178_v21  ;;  %69 = vst.msk [vmem:[#allocation9] sm:$0x1] %vm67_vm2, %v351_v5  ;;  %p302_p0 = scmp.ne.s32.totalorder %s243_s2, %s301_s28  ;;  %p306_p1 = scmp.lt.s32.totalorder %s243_s2, %s243_s2 }
   0xa   :  { %vm188_vm14 = vmand %vm426_vm12, %vm422_vm11  ;;  %p307_p2 = scmp.lt.s32.totalorder %s305_s29, %s301_s28 }
   0xb   :  { %v84_v6 = vld [vmem:[#allocation2] sm:$0xff]  ;;  %v85_v9 = vld [vmem:[#allocation2 + $0x8] sm:$0xff] }
   0xc   :  { %v134_v33 = vld [vmem:[#allocation4] sm:$0xff]  ;;  %v92_v39 = vld [vmem:[#allocation3] sm:$0xff]  ;;  %p308_p3 = por %p307_p2, %p306_p1 }
   0xd   :  { %v93_v43 = vld [vmem:[#allocation3 + $0x8] sm:$0xff]  ;;  %v135_v48 = vld [vmem:[#allocation4 + $0x8] sm:$0xff] }
   0xe   :  { %p309_p4 = pnand %p308_p3, %p302_p0 }
  0x1c   :  { %137 = vperm.xlu0 %288, %v82_v4  }
  0x8f   :  { %v87_v7 = vpop.xlane.xlu0 %86 }
  0x90   :  { %v90_v8 = vmax.f32 %v84_v6, %v87_v7 }
  0x92   :  { %v94_v10 = vsub.f32 %v84_v6, %v90_v8  ;;  %127 = vst.msk [vmem:[#allocation2] sm:$0xff] %vm73_vm0, %v90_v8  ;;  %104 = vperm.xlu1 %287, %v90_v8  }
  0x93   :  { %v89_v11 = vpop.xlane.xlu0 %88 }
  0x94   :  { %v91_v12 = vmax.f32 %v85_v9, %v89_v11  ;;  %v96_v36 = vmul.f32 1.442695, %v94_v10 }
  0x96   :  { %v95_v14 = vsub.f32 %v85_v9, %v91_v12  ;;  %128 = vst.msk [vmem:[#allocation2 + $0x8] sm:$0xff] %vm73_vm0, %v91_v12  ;;  %109 = vperm.xlu1 %287, %v91_v12  }
  0x98   :  { %v98_v37 = vmul.f32 1.442695, %v95_v14 }
  0x99   :  { %v163_v54 = vld [vmem:[#allocation2] sm:$0xff] }
  0x9a   :  { %140 = vperm.xlu1 %287, %v83_v15  }
  0x9b   :  { %v138_v17 = vpop.permute.xlu0 %137 }
  0x9c   :  { %vm142_vm1 = vcmp.eq.s32.totalorder %v130_v16, %v138_v17 }
  0x9d   :  { %v144_v18 = vsel %vm142_vm1, %v80_v0, 0.0  ;;  %v164_v58 = vld [vmem:[#allocation2 + $0x8] sm:$0xff] }
  0x9e   :  { %146 = vadd.xlane.f32.xlu0 %v144_v18 }
 0x111   :  { %v105_v23 = vpop.permute.xlu1 %104 }
 0x112   :  { %v112_v24 = vsub.f32 %v80_v0, %v105_v23 }
 0x114   :  { %v114_v25 = vmul.f32 1.442695, %v112_v24 }
 0x115   :  { %v110_v26 = vpop.permute.xlu1 %109 }
 0x116   :  { %289 = vpow2.f32 %v114_v25  ;;  %v113_v27 = vsub.f32 %v81_v2, %v110_v26 }
 0x118   :  { %v116_v28 = vmul.f32 1.442695, %v113_v27 }
 0x119   :  { %v141_v30 = vpop.permute.xlu1 %140 }
 0x11a   :  { %291 = vpow2.f32 %v116_v28  ;;  %vm143_vm7 = vcmp.eq.s32.totalorder %v130_v16, %v141_v30 }
 0x11b   :  { %v145_v32 = vsel %vm143_vm7, %v81_v2, 0.0  ;;  %293 = vpow2.f32 %v96_v36 }
 0x11c   :  { %295 = vpow2.f32 %v98_v37 }
 0x120   :  { %v290_v29 = vpop.eup %289 }
 0x121   :  { %118 = vadd.xlane.f32.xlu1 %v290_v29  ;;  %v189_v29 = vld [vmem:[#allocation7] sm:$0x1] }
 0x124   :  { %v292_v31 = vpop.eup %291 }
 0x125   :  { %120 = vadd.xlane.f32.xlu1 %v292_v31  ;;  %v294_v38 = vpop.eup %293  ;;  %v216_v31 = vld [vmem:[#allocation9] sm:$0x1] }
 0x126   :  { %v100_v40 = vmul.f32 %v294_v38, %v92_v39  ;;  %v296_v41 = vpop.eup %295 }
 0x127   :  { %v101_v45 = vmul.f32 %v296_v41, %v93_v43 }
 0x129   :  { %148 = vadd.xlane.f32.xlu1 %v145_v32 }
 0x12b   :  { %v147_v34 = vpop.xlane.xlu0 %146 }
 0x12c   :  { %v150_v35 = vadd.f32 %v147_v34, %v134_v33 }
 0x12e   :  { %152 = vst.msk [vmem:[#allocation4] sm:$0xff] %vm73_vm0, %v150_v35 }
 0x135   :  { %v167_v52 = vld [vmem:[#allocation4] sm:$0xff] }
 0x136   :  { %vm212_vm10 = vcmp.ge.f32.partialorder %v167_v52, %v163_v54 }
 0x137   :  { %vm214_vm13 = vmand %vm187_vm6, %vm212_vm10 }
 0x138   :  { %v276_v60 = vsel %vm214_vm13, 1.0, %v351_v5 }
 0x139   :  { %v221_v0 = vsel %vm73_vm0, %v276_v60, 0.0 }
 0x1ae   :  { %v119_v42 = vpop.xlane.xlu1 %118 }
 0x1af   :  { %v122_v44 = vadd.f32 %v119_v42, %v100_v40 }
 0x1b1   :  { %125 = vst.msk [vmem:[#allocation3] sm:$0xff] %vm73_vm0, %v122_v44 }
 0x1b2   :  { %v121_v46 = vpop.xlane.xlu1 %120 }
 0x1b3   :  { %v123_v47 = vadd.f32 %v121_v46, %v101_v45 }
 0x1b5   :  { %126 = vst.msk [vmem:[#allocation3 + $0x8] sm:$0xff] %vm73_vm0, %v123_v47 }
 0x1b6   :  { %v149_v49 = vpop.xlane.xlu1 %148 }
 0x1b7   :  { %v151_v50 = vadd.f32 %v149_v49, %v135_v48 }
 0x1b8   :  { %v157_v51 = vld [vmem:[#allocation3] sm:$0xff] }
 0x1b9   :  { %153 = vst.msk [vmem:[#allocation4 + $0x8] sm:$0xff] %vm73_vm0, %v151_v50  ;;  %297 = vlog2.f32 %v157_v51 }
 0x1bc   :  { %v158_v56 = vld [vmem:[#allocation3 + $0x8] sm:$0xff] }
 0x1bd   :  { %299 = vlog2.f32 %v158_v56 }
 0x1c0   :  { %v168_v59 = vld [vmem:[#allocation4 + $0x8] sm:$0xff] }
 0x1c1   :  { %vm213_vm15 = vcmp.ge.f32.partialorder %v168_v59, %v164_v58 }
 0x1c2   :  { %vm215_vm1 = vmand %vm188_vm14, %vm213_vm15 }
 0x1c3   :  { %v298_v61 = vpop.eup %297  ;;  %v277_v62 = vsel %vm215_vm1, 1.0, %v351_v5 }
 0x1c4   :  { %v160_v63 = vmul.f32 0.6931472, %v298_v61  ;;  %v222_v1 = vsel %vm73_vm0, %v277_v62, 0.0 }
 0x1c5   :  { %v223_v2 = vadd.f32 %v222_v1, %v221_v0 }
 0x1c6   :  { %v165_v3 = vadd.f32 %v163_v54, %v160_v63 }
 0x1c7   :  { %v300_v4 = vpop.eup %299 }
 0x1c8   :  { %v162_v6 = vmul.f32 0.6931472, %v300_v4  ;;  %v190_v7 = vsub.f32 %v165_v3, %v167_v52 }
 0x1ca   :  { %v166_v8 = vadd.f32 %v164_v58, %v162_v6  ;;  %v192_v10 = vsel %vm187_vm6, %v190_v7, 0.0 }
 0x1cb   :  { %v194_v12 = vsel %vm73_vm0, %v192_v10, 0.0 }
 0x1cc   :  { %v191_v9 = vsub.f32 %v166_v8, %v168_v59 }
 0x1ce   :  { %v193_v11 = vsel %vm188_vm14, %v191_v9, 0.0 }
 0x1cf   :  { %v195_v13 = vsel %vm73_vm0, %v193_v11, 0.0 }
 0x1d0   :  { %v196_v14 = vadd.f32 %v195_v13, %v194_v12 }
 0x1d2   :  { %197 = vadd.xlane.f32.xlu1 %v196_v14 }
 0x1d6   :  { %224 = vadd.xlane.f32.xlu1 %v223_v2 }
 0x25f   :  { %v198_v15 = vpop.xlane.xlu1 %197 }
 0x260   :  { %v199_v16 = vrot.slane %v198_v15, 4 }
 0x262   :  { %v200_v17 = vadd.f32 %v199_v16, %v198_v15 }
 0x263   :  { %v225_v18 = vpop.xlane.xlu1 %224 }
 0x264   :  { %v201_v19 = vrot.slane %v200_v17, 2  ;;  %v226_v20 = vrot.slane %v225_v18, 4 }
 0x266   :  { %v227_v21 = vadd.f32 %v226_v20, %v225_v18  ;;  %v202_v22 = vadd.f32 %v201_v19, %v200_v17 }
 0x268   :  { %v228_v23 = vrot.slane %v227_v21, 2  ;;  %v203_v24 = vrot.slane %v202_v22, 1 }
 0x26a   :  { %v229_v25 = vadd.f32 %v228_v23, %v227_v21  ;;  %v204_v26 = vadd.f32 %v203_v24, %v202_v22 }
 0x26c   :  { %278 = vpush %v204_v26  ;;  %v230_v27 = vrot.slane %v229_v25, 1 }
 0x26e   :  { %v231_v28 = vadd.f32 %v230_v27, %v229_v25 }
 0x270   :  { %280 = vpush %v231_v28 }
 0x29d   :  { %s279_s24 = spop %278 }
 0x29e   :  { %v206_v5 = vstv %s279_s24 }
 0x29f   :  { %v207_v30 = vadd.f32 %v206_v5, %v189_v29 }
 0x2a1   :  { %209 = vst.msk [vmem:[#allocation7] sm:$0x1] %vm67_vm2, %v207_v30  ;;  %s281_s27 = spop %280 }
 0x2a2   :  { %v233_v32 = vstv %s281_s27 }
 0x2a3   :  { %312 = shalt.err (!%p309_p4)
}
 0x2a4   :  { %s313_s6 = scalar_lea.hbm %s493_s3, 16 }
 0x2a5   :  { %p314_p5 = scmp.ne.s32.totalorder %s493_s3, %s313_s6  ;;  %p317_p6 = scmp.lt.u32.totalorder %s313_s6, %s493_s3 }
 0x2a7   :  { %p319_p7 = pnand %p317_p6, %p314_p5 }
 0x2a9   :  { %322 = shalt.err (!%p319_p7)
}
 0x2aa   :  { %245 = dma.vmem_to_hbm [thread:$0]  %s243_s2, 16, %s493_s3, [#allocation8]   ;;  %v234_v33 = vadd.f32 %v233_v32, %v216_v31 }
 0x2ab   :  { %s323_s13 = scalar_lea.vmem %s253_s26, 16  ;;  %s327_s14 = scalar_lea.vmem %s253_s26, 32 }
 0x2ac   :  { %235 = vst.msk [vmem:[#allocation9] sm:$0x1] %vm67_vm2, %v234_v33  ;;  %p324_p8 = scmp.ne.s32.totalorder %s253_s26, %s323_s13  ;;  %p328_p9 = scmp.lt.s32.totalorder %s253_s26, %s253_s26 }
 0x2ad   :  { %p329_p10 = scmp.lt.s32.totalorder %s327_s14, %s323_s13 }
 0x2af   :  { %p330_p11 = por %p329_p10, %p328_p9 }
 0x2b1   :  { %p331_p12 = pnand %p330_p11, %p324_p8 }
 0x2b3   :  { %334 = shalt.err (!%p331_p12)
}
 0x2b4   :  { %s335_s17 = scalar_lea.hbm %s494_s4, 16 }
 0x2b5   :  { %p336_p13 = scmp.ne.s32.totalorder %s494_s4, %s335_s17  ;;  %p339_p0 = scmp.lt.u32.totalorder %s335_s17, %s494_s4 }
 0x2b7   :  { %p341_p1 = pnand %p339_p0, %p336_p13 }
 0x2b9   :  { %344 = shalt.err (!%p341_p1)
}
 0x2ba   :  { %255 = dma.vmem_to_hbm [thread:$0]  %s253_s26, 16, %s494_s4, [#allocation10]  }
 0x2bb   :  { %345 = dma.done.wait [#allocation8], 16  }
 0x2bc   :  { %346 = vsyncadd [#allocation8], 4294967280 }
 0x2bd   :  { %347 = dma.done.wait [#allocation10], 16  }
 0x2be   :  { %348 = vsyncadd [#allocation10], 4294967280 }
 0x2bf   :  { %262 = vsyncpa [#allocation8], 1 }
 0x2c0   :  { %263 = vsyncpa [#allocation10], 1 }

</bundles_post_ra>
